<compile_context>
chip_gen: v5e
topology: v5e:2x2
jax: 0.10.0
libtpu: 0.0.40
codegen_flags: <defaults>
</compile_context>

<pallas_src>
import functools

import numpy as np
import jax
import jax.numpy as jnp
from jax.experimental import pallas as pl
from jax.experimental.pallas import tpu as pltpu


# ----------------------------- problem sizes --------------------------------
D_IN = 16            # features.input_dim
H = 32               # features.output_dim (hidden width)
O = 10               # output_dim per head
NUM_HEADS = 4        # num_outputs
HO = NUM_HEADS * O   # 40 = width of the fused all-heads matmul output

LANES = 128          # lane-dense padded width of every 128-wide buffer
assert H + O <= LANES, "activation + selected output must fit one 128-lane slab"

DEFAULT_TB = 256     # default batch tile (rows per grid step)


def _round_up(n, m):
    return ((n + m - 1) // m) * m


# ------------------------------ Pallas kernel -------------------------------
def multihead_kernel(x_ref, task_ref, wf_ref, bf_ref, wc_ref, bc_ref, sel_ref,
                     out_ref):
    """One batch tile: feature linear + ReLU + fused heads + task selection.

    x_ref   : [TB, D_IN]  f32    raw features
    task_ref: [TB, 1]     int32  per-sample head id
    wf_ref  : [D_IN, 128]        feature weight (cols >= H are zero); f32 or bf16
    bf_ref  : [1, 128]    f32    feature bias   (cols >= H are zero)
    wc_ref  : [128, 128]         all heads concatenated: [:, k*O + o] = W_k[:, o]
    bc_ref  : [1, 128]    f32    concatenated head biases
    sel_ref : [128, 128]         constant 0/1 matrix: sel[k*O + o, H + o] = 1
    out_ref : [TB, 128]   f32    combined slab: [:, :H] = activation,
                                 [:, H:H+O] = selected head output
    """
    tb = x_ref.shape[0]
    wf = wf_ref[...]
    cdt = wf.dtype                      # MXU compute dtype (f32 or bf16)

    # features(x) + ReLU (one MXU matmul); lanes >= H are exactly zero.
    h = jnp.dot(x_ref[...].astype(cdt), wf, preferred_element_type=jnp.float32)
    h = jnp.maximum(h + bf_ref[...], 0.0)                       # [TB, 128] f32

    # all classifier heads in one fused matmul -> [TB, 128]
    y = jnp.dot(h.astype(cdt), wc_ref[...], preferred_element_type=jnp.float32)
    y = y + bc_ref[...]

    # per-sample head-segment mask: one iota + two compares (no per-head where)
    col = jax.lax.broadcasted_iota(jnp.int32, (tb, LANES), 1)
    lo = task_ref[...] * O                                      # [TB, 1]
    # NOTE: task ids outside [0, NUM_HEADS) give an all-zero output segment,
    # whereas torch indexing would raise; acceptable for in-range task ids.
    mask = (col >= lo) & (col < lo + O)
    y_sel = jnp.where(mask, y, 0.0)

    # compact the selected O-wide segment into lanes [H, H+O) via a constant
    # 0/1 matmul and fuse it with the activation slab (h is zero there), so the
    # kernel emits a single full-width, unmasked store per row.
    out_ref[...] = h + jnp.dot(y_sel.astype(cdt), sel_ref[...],
                               preferred_element_type=jnp.float32)


# -------------------------- one-time parameter prep --------------------------
def prepare_params(wf, bf, wc, bc, *, use_bf16=False):
    """Flatten + zero-pad weights once (numpy, outside the jitted hot path).

    wf: [D_IN, H]   bf: [1, H]   wc: [NUM_HEADS, H, O]   bc: [NUM_HEADS, O]
    use_bf16: cast matmul operands (weights / selection matrix) to bfloat16
              for the v6e / v7x MXU; biases stay f32.
    """
    wdt = jnp.bfloat16 if use_bf16 else jnp.float32

    wf_pad = np.zeros((D_IN, LANES), np.float32)
    wf_pad[:, :H] = np.asarray(wf, np.float32)
    bf_pad = np.zeros((1, LANES), np.float32)
    bf_pad[:, :H] = np.asarray(bf, np.float32)

    wc_flat = np.transpose(np.asarray(wc, np.float32), (1, 0, 2)).reshape(H, HO)
    wc_pad = np.zeros((LANES, LANES), np.float32)
    wc_pad[:H, :HO] = wc_flat
    bc_pad = np.zeros((1, LANES), np.float32)
    bc_pad[:, :HO] = np.asarray(bc, np.float32).reshape(1, HO)

    sel = np.zeros((LANES, LANES), np.float32)
    rows = np.arange(HO)
    sel[rows, H + (rows % O)] = 1.0          # compaction targets lanes [H, H+O)

    return (jnp.asarray(wf_pad, wdt), jnp.asarray(bf_pad, jnp.float32),
            jnp.asarray(wc_pad, wdt), jnp.asarray(bc_pad, jnp.float32),
            jnp.asarray(sel, wdt))


# -------------------------------- wrapper ------------------------------------
@functools.partial(jax.jit, static_argnames=("tb",))
def multihead_forward(inp, params, *, tb=DEFAULT_TB):
    """Mirrors MultiheadNetwork.forward: returns (output, state).

    inp    : [B, D_IN + 1]  torch-style packed input (last column = task id)
    params : output of prepare_params()
    """
    wf_pad, bf_pad, wc_pad, bc_pad, sel = params
    B = inp.shape[0]

    # split off the task column in plain JAX, outside the kernel
    x = inp[:, :D_IN].astype(jnp.float32)
    task = inp[:, D_IN:].astype(jnp.int32)                    # [B, 1]

    # batch tiling: big tiles amortize per-step overhead; pad ragged batches
    tb = min(tb, _round_up(B, 8))
    b_pad = _round_up(B, tb)
    if b_pad != B:
        x = jnp.pad(x, ((0, b_pad - B), (0, 0)))
        task = jnp.pad(task, ((0, b_pad - B), (0, 0)))        # task 0 is in range

    grid_spec = pltpu.PrefetchScalarGridSpec(
        num_scalar_prefetch=0,
        grid=(b_pad // tb,),
        in_specs=[
            pl.BlockSpec((tb, D_IN), lambda i: (i, 0)),       # x
            pl.BlockSpec((tb, 1), lambda i: (i, 0)),          # task (int32)
            pl.BlockSpec((D_IN, LANES), lambda i: (0, 0)),    # wf (replicated)
            pl.BlockSpec((1, LANES), lambda i: (0, 0)),       # bf
            pl.BlockSpec((LANES, LANES), lambda i: (0, 0)),   # wc (fused heads)
            pl.BlockSpec((1, LANES), lambda i: (0, 0)),       # bc
            pl.BlockSpec((LANES, LANES), lambda i: (0, 0)),   # selection matrix
        ],
        out_specs=pl.BlockSpec((tb, LANES), lambda i: (i, 0)),  # combined slab
    )

    slab = pl.pallas_call(
        multihead_kernel,
        out_shape=jax.ShapeDtypeStruct((b_pad, LANES), jnp.float32),
        grid_spec=grid_spec,
        compiler_params=pltpu.CompilerParams(
            dimension_semantics=("parallel",)),
    )(x, task, wf_pad, bf_pad, wc_pad, bc_pad, sel)

    # Module-level return semantics. (A downstream Pallas consumer could take
    # `slab` directly and skip these slices; inside a larger jit XLA fuses them
    # into the consumer.)
    activation = slab[:B, :H]
    output = slab[:B, H:H + O]
    state = {"activation": [activation]}     # mirrors the torch `state` return
    return output, state


# ---------------------------------- main -------------------------------------
if __name__ == "__main__":
    B = 32   # small demo batch
    key = jax.random.PRNGKey(0)
    k_x, k_t, k_wf, k_bf, k_wc, k_bc = jax.random.split(key, 6)

    # deterministic synthetic inputs / parameters (not a checkpoint load)
    x = jax.random.normal(k_x, (B, D_IN), dtype=jnp.float32)
    task = jax.random.randint(k_t, (B, 1), 0, NUM_HEADS)               # int32
    inp = jnp.concatenate([x, task.astype(jnp.float32)], axis=-1)      # [B, D_IN+1]

    wf = jax.random.normal(k_wf, (D_IN, H), dtype=jnp.float32) * 0.1
    bf = jax.random.normal(k_bf, (1, H), dtype=jnp.float32) * 0.1
    wc = jax.random.normal(k_wc, (NUM_HEADS, H, O), dtype=jnp.float32) * 0.1
    bc = jax.random.normal(k_bc, (NUM_HEADS, O), dtype=jnp.float32) * 0.1

    # pure-JAX reference
    h_ref = jnp.maximum(x @ wf + bf, 0.0)                              # [B, H]
    heads = jnp.einsum("bh,kho->kbo", h_ref, wc) + bc[:, None, :]      # [K, B, O]
    out_ref = heads[task[:, 0], jnp.arange(B), :]                      # [B, O]

    # --- f32 path (default tile; tile shrinks to the batch for small B) ------
    params_f32 = prepare_params(wf, bf, wc, bc, use_bf16=False)
    output, state = multihead_forward(inp, params_f32)
    output = jax.block_until_ready(output)
    activation = jax.block_until_ready(state["activation"][-1])
    assert jnp.allclose(activation, h_ref, atol=1e-5, rtol=1e-5)
    assert jnp.allclose(output, out_ref, atol=1e-5, rtol=1e-5)

    # --- bf16 MXU-operand path (v6e/v7x), small tile -> multi-step grid ------
    params_bf16 = prepare_params(wf, bf, wc, bc, use_bf16=True)
    output16, state16 = multihead_forward(inp, params_bf16, tb=16)     # grid=(2,)
    output16 = jax.block_until_ready(output16)
    activation16 = jax.block_until_ready(state16["activation"][-1])
    assert jnp.allclose(activation16, h_ref, atol=5e-2, rtol=5e-2)
    assert jnp.allclose(output16, out_ref, atol=5e-2, rtol=5e-2)

    print("KERNEL_OK")
</pallas_src>

<mosaic_0001>
module attributes {stable_mosaic.version = 11 : i64} {
  func.func @multihead_kernel(%arg0: i32, %arg1: memref<32x16xf32, #tpu.memory_space<vmem>>, %arg2: memref<32x1xi32, #tpu.memory_space<vmem>>, %arg3: memref<16x128xf32, #tpu.memory_space<vmem>>, %arg4: memref<1x128xf32, #tpu.memory_space<vmem>>, %arg5: memref<128x128xf32, #tpu.memory_space<vmem>>, %arg6: memref<1x128xf32, #tpu.memory_space<vmem>>, %arg7: memref<128x128xf32, #tpu.memory_space<vmem>>, %arg8: memref<32x128xf32, #tpu.memory_space<vmem>>) attributes {dimension_semantics = [#tpu.dimension_semantics<parallel>], iteration_bounds = array<i64: 1>, scalar_prefetch = 0 : i64, scratch_operands = 0 : i64, tpu.core_type = #tpu.core_type<tc>, window_params = [{transform_indices = @transform_0, window_bounds = array<i64: 32, 16>}, {transform_indices = @transform_1, window_bounds = array<i64: 32, 1>}, {pipeline_mode = #tpu.pipeline_mode<synchronous>, transform_indices = @transform_2, window_bounds = array<i64: 16, 128>}, {pipeline_mode = #tpu.pipeline_mode<synchronous>, transform_indices = @transform_3, window_bounds = array<i64: 1, 128>}, {pipeline_mode = #tpu.pipeline_mode<synchronous>, transform_indices = @transform_4, window_bounds = array<i64: 128, 128>}, {pipeline_mode = #tpu.pipeline_mode<synchronous>, transform_indices = @transform_5, window_bounds = array<i64: 1, 128>}, {pipeline_mode = #tpu.pipeline_mode<synchronous>, transform_indices = @transform_6, window_bounds = array<i64: 128, 128>}, {transform_indices = @transform_7, window_bounds = array<i64: 32, 128>}]} {
    %c0 = arith.constant 0 : index
    %c0_0 = arith.constant 0 : index
    %0 = vector.load %arg3[%c0, %c0_0] : memref<16x128xf32, #tpu.memory_space<vmem>>, vector<16x128xf32>
    %c0_1 = arith.constant 0 : index
    %c0_2 = arith.constant 0 : index
    %1 = vector.load %arg1[%c0_1, %c0_2] : memref<32x16xf32, #tpu.memory_space<vmem>>, vector<32x16xf32>
    %cst = arith.constant dense<0.000000e+00> : vector<32x128xf32>
    %2 = tpu.matmul %1, %0, %cst {dimension_numbers = #tpu.dot_dimension_numbers<[1], [0], [0], [1], [0, 0, 1, 1], [], []>} : vector<32x16xf32>, vector<16x128xf32>, vector<32x128xf32> -> vector<32x128xf32>
    %c0_3 = arith.constant 0 : index
    %c0_4 = arith.constant 0 : index
    %3 = vector.load %arg4[%c0_3, %c0_4] : memref<1x128xf32, #tpu.memory_space<vmem>>, vector<1x128xf32>
    %4 = vector.broadcast %3 : vector<1x128xf32> to vector<32x128xf32>
    %5 = arith.addf %2, %4 : vector<32x128xf32>
    %cst_5 = arith.constant 0.000000e+00 : f32
    %6 = vector.broadcast %cst_5 : f32 to vector<32x128xf32>
    %7 = arith.maximumf %5, %6 : vector<32x128xf32>
    %c0_6 = arith.constant 0 : index
    %c0_7 = arith.constant 0 : index
    %8 = vector.load %arg5[%c0_6, %c0_7] : memref<128x128xf32, #tpu.memory_space<vmem>>, vector<128x128xf32>
    %cst_8 = arith.constant dense<0.000000e+00> : vector<32x128xf32>
    %9 = tpu.matmul %7, %8, %cst_8 {dimension_numbers = #tpu.dot_dimension_numbers<[1], [0], [0], [1], [0, 0, 1, 1], [], []>} : vector<32x128xf32>, vector<128x128xf32>, vector<32x128xf32> -> vector<32x128xf32>
    %c0_9 = arith.constant 0 : index
    %c0_10 = arith.constant 0 : index
    %10 = vector.load %arg6[%c0_9, %c0_10] : memref<1x128xf32, #tpu.memory_space<vmem>>, vector<1x128xf32>
    %11 = vector.broadcast %10 : vector<1x128xf32> to vector<32x128xf32>
    %12 = arith.addf %9, %11 : vector<32x128xf32>
    %13 = tpu.iota {dimensions = array<i32: 1>} : vector<32x128xi32>
    %c0_11 = arith.constant 0 : index
    %c0_12 = arith.constant 0 : index
    %14 = vector.load %arg2[%c0_11, %c0_12] : memref<32x1xi32, #tpu.memory_space<vmem>>, vector<32x1xi32>
    %c10_i32 = arith.constant 10 : i32
    %15 = vector.broadcast %c10_i32 : i32 to vector<32x1xi32>
    %16 = arith.muli %14, %15 : vector<32x1xi32>
    %17 = vector.broadcast %16 : vector<32x1xi32> to vector<32x128xi32>
    %18 = arith.cmpi sge, %13, %17 : vector<32x128xi32>
    %c10_i32_13 = arith.constant 10 : i32
    %19 = vector.broadcast %c10_i32_13 : i32 to vector<32x1xi32>
    %20 = arith.addi %16, %19 : vector<32x1xi32>
    %21 = vector.broadcast %20 : vector<32x1xi32> to vector<32x128xi32>
    %22 = arith.cmpi slt, %13, %21 : vector<32x128xi32>
    %23 = arith.andi %18, %22 : vector<32x128xi1>
    %cst_14 = arith.constant 0.000000e+00 : f32
    %24 = vector.broadcast %cst_14 : f32 to vector<32x128xf32>
    %25 = arith.select %23, %12, %24 : vector<32x128xi1>, vector<32x128xf32>
    %c0_15 = arith.constant 0 : index
    %c0_16 = arith.constant 0 : index
    %26 = vector.load %arg7[%c0_15, %c0_16] : memref<128x128xf32, #tpu.memory_space<vmem>>, vector<128x128xf32>
    %cst_17 = arith.constant dense<0.000000e+00> : vector<32x128xf32>
    %27 = tpu.matmul %25, %26, %cst_17 {dimension_numbers = #tpu.dot_dimension_numbers<[1], [0], [0], [1], [0, 0, 1, 1], [], []>} : vector<32x128xf32>, vector<128x128xf32>, vector<32x128xf32> -> vector<32x128xf32>
    %28 = arith.addf %7, %27 : vector<32x128xf32>
    %c0_18 = arith.constant 0 : index
    %c0_19 = arith.constant 0 : index
    %29 = vector.load %arg8[%c0_18, %c0_19] : memref<32x128xf32, #tpu.memory_space<vmem>>, vector<32x128xf32>
    tpu.vector_store %arg8[%c0_18, %c0_19], %28 {strides = array<i32>} : memref<32x128xf32, #tpu.memory_space<vmem>>, vector<32x128xf32>,
    return
  }
  func.func @transform_0(%arg0: i32) -> (i32, i32) {
    %c0_i32 = arith.constant 0 : i32
    %c0_i32_0 = arith.constant 0 : i32
    return %arg0, %c0_i32 : i32, i32
  }
  func.func @transform_1(%arg0: i32) -> (i32, i32) {
    %c0_i32 = arith.constant 0 : i32
    %c0_i32_0 = arith.constant 0 : i32
    return %arg0, %c0_i32 : i32, i32
  }
  func.func @transform_2(%arg0: i32) -> (i32, i32) {
    %c0_i32 = arith.constant 0 : i32
    %c0_i32_0 = arith.constant 0 : i32
    %c0_i32_1 = arith.constant 0 : i32
    return %c0_i32, %c0_i32_0 : i32, i32
  }
  func.func @transform_3(%arg0: i32) -> (i32, i32) {
    %c0_i32 = arith.constant 0 : i32
    %c0_i32_0 = arith.constant 0 : i32
    %c0_i32_1 = arith.constant 0 : i32
    return %c0_i32, %c0_i32_0 : i32, i32
  }
  func.func @transform_4(%arg0: i32) -> (i32, i32) {
    %c0_i32 = arith.constant 0 : i32
    %c0_i32_0 = arith.constant 0 : i32
    %c0_i32_1 = arith.constant 0 : i32
    return %c0_i32, %c0_i32_0 : i32, i32
  }
  func.func @transform_5(%arg0: i32) -> (i32, i32) {
    %c0_i32 = arith.constant 0 : i32
    %c0_i32_0 = arith.constant 0 : i32
    %c0_i32_1 = arith.constant 0 : i32
    return %c0_i32, %c0_i32_0 : i32, i32
  }
  func.func @transform_6(%arg0: i32) -> (i32, i32) {
    %c0_i32 = arith.constant 0 : i32
    %c0_i32_0 = arith.constant 0 : i32
    %c0_i32_1 = arith.constant 0 : i32
    return %c0_i32, %c0_i32_0 : i32, i32
  }
  func.func @transform_7(%arg0: i32) -> (i32, i32) {
    %c0_i32 = arith.constant 0 : i32
    %c0_i32_0 = arith.constant 0 : i32
    return %arg0, %c0_i32 : i32, i32
  }
}

</mosaic_0001>

<bundles_post_ra>
// kernel: multihead_forward.1
= control target key start
LH: loop header
LB: loop body
LE: loop exit
PB: predicated region body
PF: predicated region fallthrough
CT: control target
= control target key end

     0   :  { %12 = vsyncpa [#allocation3], 0  ;;  %s502_s0 = inlined_call_operand.vmem [shape: f32[32,16], index: 0, kind: input, shape index: {}]   ;;  %s503_s1 = inlined_call_operand.vmem [shape: s32[32,1], index: 1, kind: input, shape index: {}]   ;;  %s504_s2 = inlined_call_operand.vmem [shape: f32[16,128], index: 2, kind: input, shape index: {}]   ;;  %s505_s3 = inlined_call_operand.vmem [shape: f32[1,128], index: 3, kind: input, shape index: {}]   ;;  %s506_s4 = inlined_call_operand.hbm [shape: f32[128,128], index: 4, kind: input, shape index: {}]   ;;  %s507_s5 = inlined_call_operand.vmem [shape: f32[1,128], index: 5, kind: input, shape index: {}]   ;;  %s508_s6 = inlined_call_operand.hbm [shape: f32[128,128], index: 6, kind: input, shape index: {}]   ;;  %s509_s7 = inlined_call_operand.vmem [shape: f32[32,128], index: 7, kind: output, shape index: {}]  }
   0x1   :  { %s26_s26 = sshll.u32 %s506_s4, 4  ;;  %s27_s26 = int_to_ptr.hbm [resolvable:$true] %s26_s26 }
   0x2   :  { %13 = vsyncpa [#allocation5], 0  ;;  %s378_s27 = smov [#allocation2]   ;;  %s41_s8 = sshll.u32 %s508_s6, 4  ;;  %s42_s8 = int_to_ptr.hbm [resolvable:$true] %s41_s8 }
   0x3   :  { %s28_s28 = sshll.u32 %s378_s27, 4  ;;  %s379_s9 = smov 128   ;;  %s29_s28 = int_to_ptr.vmem [resolvable:$true] %s28_s28 }
   0x4   :  { %s380_s10 = smov 8   ;;  %s381_s11 = smov [#allocation4]  }
   0x5   :  { %34 = dma.hbm_to_vmem [thread:$0]  %s27_s26, 2048, %s29_s28, [#allocation3], %s379_s9, %s379_s9, %s380_s10  }
   0x6   :  { %s43_s12 = sshll.u32 %s381_s11, 4  ;;  %s44_s12 = int_to_ptr.vmem [resolvable:$true] %s43_s12 }
   0x7   :  { %49 = dma.hbm_to_vmem [thread:$0]  %s42_s8, 2048, %s44_s12, [#allocation5], %s379_s9, %s379_s9, %s380_s10  }
   0x8   :  { %374 = dma.done.wait [#allocation3], 2048  }
   0x9   :  { %375 = vsyncadd [#allocation3], 4294965248 }
   0xa   :  { %376 = dma.done.wait [#allocation5], 2048  }
   0xb   :  { %377 = vsyncadd [#allocation5], 4294965248  ;;  %v382_v0 = vmov 0   ;;  %v59_v1 = vld [vmem:[%s504_s2 + $0x8] sm:$0xff]  ;;  %v58_v2 = vld [vmem:[%s504_s2] sm:$0xff]  ;;  %vm68_vm0 = vcmask 130048  }
   0xc   :  { %322 = vset.pattern.permute.xlu1 %v382_v0  ;;  %321 = vset.pattern.permute.xlu0 %v382_v0  ;;  %v60_v3 = vld [vmem:[%s502_s0] sm:$0xff]  ;;  %v129_v4 = vld [vmem:[#allocation2 + $0x78] sm:$0xff]  ;;  %v128_v5 = vld [vmem:[#allocation2 + $0x70] sm:$0xff] }
   0xd   :  { %323 = vset.pattern.permute.xlu2 %v382_v0  ;;  %95 = vmatpush.msra.mxu0 %v59_v1  ;;  %v127_v6 = vld [vmem:[#allocation2 + $0x68] sm:$0xff]  ;;  %v126_v7 = vld [vmem:[#allocation2 + $0x60] sm:$0xff]  ;;  %v167_v8 = vld [vmem:[%s503_s1 + $0x10] sm:$0xff] }
   0xe   :  { %134 = vmatpush.msra.mxu1 %v129_v4  ;;  %284 = vmatpush.msra.mxu3 %v129_v4  ;;  %v166_v9 = vld [vmem:[%s503_s1 + $0x8] sm:$0xff]  ;;  %v171_v10 = vmul.u32 10, %v167_v8  ;;  %v125_v12 = vld [vmem:[#allocation2 + $0x58] sm:$0xff]  ;;  %v124_v14 = vld [vmem:[#allocation2 + $0x50] sm:$0xff]  ;;  %v163_v4 = vlaneseq }
   0xf   :  { %96 = vmatpush.msra.mxu0 %v58_v2  ;;  %v170_v11 = vmul.u32 10, %v166_v9  ;;  %v61_v13 = vld [vmem:[%s502_s0 + $0x8] sm:$0xff]  ;;  %v122_v17 = vld [vmem:[#allocation2 + $0x40] sm:$0xff]  ;;  %v121_v19 = vld [vmem:[#allocation2 + $0x38] sm:$0xff] }
  0x10   :  { %276 = vmatmul.msk.f32.vlgmr.msra.gmra.mxu0 %vm68_vm0, %v60_v3  ;;  %135 = vmatpush.msra.mxu1 %v128_v5  ;;  %v123_v15 = vld [vmem:[#allocation2 + $0x48] sm:$0xff]  ;;  %v191_v16 = vadd.s32 10, %v171_v10  ;;  %v62_v20 = vld [vmem:[%s502_s0 + $0x10] sm:$0xff]  ;;  %v118_v23 = vld [vmem:[#allocation2 + $0x20] sm:$0xff] }
  0x11   :  { %285 = vmatpush.msra.mxu3 %v128_v5  ;;  %180 = vperm.xlu1 %322, %v171_v10   ;;  %v190_v18 = vadd.s32 10, %v170_v11  ;;  %v120_v21 = vld [vmem:[#allocation2 + $0x30] sm:$0xff]  ;;  %v119_v22 = vld [vmem:[#allocation2 + $0x28] sm:$0xff]  ;;  %v117_v24 = vld [vmem:[#allocation2 + $0x18] sm:$0xff]  ;;  %v164_v5 = vand.u32 127, %v163_v4 }
  0x12   :  { %136 = vmatpush.msra.mxu1 %v127_v6  ;;  %177 = vperm.xlu0 %321, %v170_v11   ;;  %v63_v25 = vld [vmem:[%s502_s0 + $0x18] sm:$0xff]  ;;  %v116_v26 = vld [vmem:[#allocation2 + $0x10] sm:$0xff]  ;;  %v115_v27 = vld [vmem:[#allocation2 + $0x8] sm:$0xff] }
  0x13   :  { %286 = vmatpush.msra.mxu3 %v127_v6  ;;  %v114_v28 = vld [vmem:[#allocation2] sm:$0xff]  ;;  %v168_v33 = vld [vmem:[%s503_s1 + $0x18] sm:$0xff]  ;;  %v231_v35 = vld [vmem:[#allocation4 + $0x70] sm:$0xff] }
  0x14   :  { %137 = vmatpush.msra.mxu1 %v126_v7  ;;  %v165_v29 = vld [vmem:[%s503_s1] sm:$0xff]  ;;  %v232_v34 = vld [vmem:[#allocation4 + $0x78] sm:$0xff]  ;;  %v172_v36 = vmul.u32 10, %v168_v33  ;;  %v230_v37 = vld [vmem:[#allocation4 + $0x68] sm:$0xff] }
  0x15   :  { %287 = vmatpush.msra.mxu3 %v126_v7  ;;  %v169_v30 = vmul.u32 10, %v165_v29  ;;  %v324_v32 = vld [vmem:[%s505_s3] ss:$0 sm:$0xff]  ;;  %233 = vmatpush.msrb.mxu0 %v232_v34  ;;  %v228_v42 = vld [vmem:[#allocation4 + $0x58] sm:$0xff]  ;;  %v227_v44 = vld [vmem:[#allocation4 + $0x50] sm:$0xff] }
  0x16   :  { %138 = vmatpush.msra.mxu1 %v125_v12  ;;  %300 = vmatpush.msra.mxu2 %v232_v34  ;;  %v229_v40 = vld [vmem:[#allocation4 + $0x60] sm:$0xff]  ;;  %v192_v43 = vadd.s32 10, %v172_v36  ;;  %v226_v45 = vld [vmem:[#allocation4 + $0x48] sm:$0xff]  ;;  %v224_v50 = vld [vmem:[#allocation4 + $0x38] sm:$0xff] }
  0x17   :  { %288 = vmatpush.msra.mxu3 %v125_v12  ;;  %v189_v31 = vadd.s32 10, %v169_v30  ;;  %183 = vperm.xlu2 %323, %v172_v36   ;;  %v225_v48 = vld [vmem:[#allocation4 + $0x40] sm:$0xff]  ;;  %v223_v51 = vld [vmem:[#allocation4 + $0x30] sm:$0xff]  ;;  %v222_v52 = vld [vmem:[#allocation4 + $0x28] sm:$0xff] }
  0x18   :  { %277 = vmatmul.msk.f32.gmra.mxu0 %vm68_vm0, %v61_v13  ;;  %139 = vmatpush.msra.mxu1 %v124_v14  ;;  %v221_v55 = vld [vmem:[#allocation4 + $0x20] sm:$0xff]  ;;  %v220_v57 = vld [vmem:[#allocation4 + $0x18] sm:$0xff]  ;;  %v219_v58 = vld [vmem:[#allocation4 + $0x10] sm:$0xff] }
  0x19   :  { %289 = vmatpush.msra.mxu3 %v124_v14  ;;  %200 = vperm.xlu1 %322, %v191_v16   ;;  %v218_v62 = vld [vmem:[#allocation4 + $0x8] sm:$0xff]  ;;  %v217_v63 = vld [vmem:[#allocation4] sm:$0xff] }
  0x1a   :  { %140 = vmatpush.msra.mxu1 %v123_v15  ;;  %197 = vperm.xlu0 %321, %v190_v18   ;;  %v325_v8 = vld [vmem:[%s507_s5] ss:$0 sm:$0xff] }
  0x1b   :  { %290 = vmatpush.msra.mxu3 %v123_v15  ;;  %234 = vmatpush.msrb.mxu0 %v231_v35 }
  0x1c   :  { %141 = vmatpush.msra.mxu1 %v122_v17  ;;  %301 = vmatpush.msra.mxu2 %v231_v35 }
  0x1d   :  { %291 = vmatpush.msra.mxu3 %v122_v17  ;;  %235 = vmatpush.msrb.mxu0 %v230_v37 }
  0x1e   :  { %142 = vmatpush.msra.mxu1 %v121_v19  ;;  %302 = vmatpush.msra.mxu2 %v230_v37 }
  0x1f   :  { %292 = vmatpush.msra.mxu3 %v121_v19  ;;  %236 = vmatpush.msrb.mxu0 %v229_v40 }
  0x20   :  { %278 = vmatmul.msk.f32.gmra.mxu0 %vm68_vm0, %v62_v20  ;;  %143 = vmatpush.msra.mxu1 %v120_v21 }
  0x21   :  { %293 = vmatpush.msra.mxu3 %v120_v21  ;;  %194 = vperm.xlu1 %322, %v189_v31  }
  0x22   :  { %144 = vmatpush.msra.mxu1 %v119_v22  ;;  %174 = vperm.xlu0 %321, %v169_v30  }
  0x23   :  { %294 = vmatpush.msra.mxu3 %v119_v22  ;;  %303 = vmatpush.msra.mxu2 %v229_v40 }
  0x24   :  { %145 = vmatpush.msra.mxu1 %v118_v23  ;;  %237 = vmatpush.msrb.mxu0 %v228_v42 }
  0x25   :  { %295 = vmatpush.msra.mxu3 %v118_v23  ;;  %304 = vmatpush.msra.mxu2 %v228_v42 }
  0x26   :  { %146 = vmatpush.msra.mxu1 %v117_v24  ;;  %203 = vperm.xlu2 %323, %v192_v43  }
  0x27   :  { %296 = vmatpush.msra.mxu3 %v117_v24  ;;  %238 = vmatpush.msrb.mxu0 %v227_v44 }
  0x28   :  { %279 = vmatmul.msk.f32.gmra.mxu0 %vm68_vm0, %v63_v25  ;;  %147 = vmatpush.msra.mxu1 %v116_v26 }
  0x29   :  { %297 = vmatpush.msra.mxu3 %v116_v26  ;;  %305 = vmatpush.msra.mxu2 %v227_v44 }
  0x2a   :  { %148 = vmatpush.msra.mxu1 %v115_v27  ;;  %239 = vmatpush.msrb.mxu0 %v226_v45 }
  0x2b   :  { %298 = vmatpush.msra.mxu3 %v115_v27  ;;  %306 = vmatpush.msra.mxu2 %v226_v45 }
  0x2c   :  { %149 = vmatpush.msra.mxu1 %v114_v28  ;;  %240 = vmatpush.msrb.mxu0 %v225_v48 }
  0x2d   :  { %299 = vmatpush.msra.mxu3 %v114_v28  ;;  %307 = vmatpush.msra.mxu2 %v225_v48 }
  0x2e   :  { %241 = vmatpush.msrb.mxu0 %v224_v50 }
  0x2f   :  { %308 = vmatpush.msra.mxu2 %v224_v50 }
  0x30   :  { %242 = vmatpush.msrb.mxu0 %v223_v51 }
  0x31   :  { %309 = vmatpush.msra.mxu2 %v223_v51 }
  0x32   :  { %243 = vmatpush.msrb.mxu0 %v222_v52 }
  0x33   :  { %310 = vmatpush.msra.mxu2 %v222_v52 }
  0x34   :  { %244 = vmatpush.msrb.mxu0 %v221_v55 }
  0x35   :  { %311 = vmatpush.msra.mxu2 %v221_v55 }
  0x36   :  { %245 = vmatpush.msrb.mxu0 %v220_v57 }
  0x37   :  { %312 = vmatpush.msra.mxu2 %v220_v57 }
  0x38   :  { %246 = vmatpush.msrb.mxu0 %v219_v58 }
  0x39   :  { %313 = vmatpush.msra.mxu2 %v219_v58 }
  0x3a   :  { %247 = vmatpush.msrb.mxu0 %v218_v62 }
  0x3b   :  { %314 = vmatpush.msra.mxu2 %v218_v62 }
  0x3c   :  { %248 = vmatpush.msrb.mxu0 %v217_v63 }
  0x3d   :  { %315 = vmatpush.msra.mxu2 %v217_v63 }
  0x71   :  { %v184_v13 = vpop.permute.xlu2 %183 }
  0x72   :  { %vm188_vm10 = vcmp.ge.s32.totalorder %v164_v5, %v184_v13 }
  0x80   :  { %v204_v16 = vpop.permute.xlu2 %203 }
  0x81   :  { %vm208_vm11 = vcmp.lt.s32.totalorder %v164_v5, %v204_v16 }
  0x82   :  { %vm212_vm12 = vmand %vm188_vm10, %vm208_vm11 }
  0x83   :  { %v181_v0 = vpop.permute.xlu1 %180 }
  0x84   :  { %v178_v1 = vpop.permute.xlu0 %177  ;;  %vm187_vm7 = vcmp.ge.s32.totalorder %v164_v5, %v181_v0 }
  0x85   :  { %vm186_vm4 = vcmp.ge.s32.totalorder %v164_v5, %v178_v1 }
  0x8b   :  { %v201_v2 = vpop.permute.xlu1 %200 }
  0x8c   :  { %v198_v3 = vpop.permute.xlu0 %197  ;;  %vm207_vm8 = vcmp.lt.s32.totalorder %v164_v5, %v201_v2 }
  0x8d   :  { %v98_v38 = vpop.f32.mrf.mxu0  ;;  %vm206_vm5 = vcmp.lt.s32.totalorder %v164_v5, %v198_v3  ;;  %vm211_vm9 = vmand %vm187_vm7, %vm207_vm8 }
  0x8e   :  { %v466_v39 = vadd.f32 %v324_v32, %v98_v38  ;;  %vm210_vm6 = vmand %vm186_vm4, %vm206_vm5 }
  0x90   :  { %v110_v41 = vmax.f32 %v466_v39, 0.0 }
  0x92   :  { %150 = vmatmul.f32.vlgmr.msra.gmra.mxu1 %v110_v41 }
  0x93   :  { %v195_v7 = vpop.permute.xlu1 %194 }
  0x94   :  { %v175_v6 = vpop.permute.xlu0 %174  ;;  %vm205_vm2 = vcmp.lt.s32.totalorder %v164_v5, %v195_v7 }
  0x95   :  { %v101_v46 = vpop.f32.mrf.mxu0  ;;  %vm185_vm1 = vcmp.ge.s32.totalorder %v164_v5, %v175_v6 }
  0x96   :  { %v471_v47 = vadd.f32 %v324_v32, %v101_v46  ;;  %vm209_vm3 = vmand %vm185_vm1, %vm205_vm2 }
  0x98   :  { %v111_v49 = vmax.f32 %v471_v47, 0.0 }
  0x9a   :  { %153 = vmatmul.f32.vlgmr.msra.gmra.mxu3 %v111_v49 }
  0x9d   :  { %v104_v53 = vpop.f32.mrf.mxu0 }
  0x9e   :  { %v476_v54 = vadd.f32 %v324_v32, %v104_v53 }
  0xa0   :  { %v112_v56 = vmax.f32 %v476_v54, 0.0 }
  0xa2   :  { %156 = vmatmul.f32.gmra.mxu3 %v112_v56 }
  0xa5   :  { %v107_v59 = vpop.f32.mrf.mxu0 }
  0xa6   :  { %v108_v60 = vadd.f32 %v324_v32, %v107_v59 }
  0xa8   :  { %v113_v61 = vmax.f32 %v108_v60, 0.0 }
  0xaa   :  { %159 = vmatmul.f32.gmra.mxu3 %v113_v61 }
 0x10f   :  { %v151_v9 = vpop.f32.mrf.mxu1 }
 0x110   :  { %v152_v10 = vadd.f32 %v325_v8, %v151_v9 }
 0x112   :  { %280 = vmatmul.msk.f32.vlgmr.msrb.gmra.mxu0 %vm209_vm3, %v152_v10 }
 0x11d   :  { %v154_v11 = vpop.f32.mrf.mxu3 }
 0x11e   :  { %v155_v12 = vadd.f32 %v325_v8, %v154_v11 }
 0x120   :  { %281 = vmatmul.msk.f32.vlgmr.msra.gmra.mxu2 %vm210_vm6, %v155_v12 }
 0x125   :  { %v157_v14 = vpop.f32.mrf.mxu3 }
 0x126   :  { %v158_v15 = vadd.f32 %v325_v8, %v157_v14 }
 0x128   :  { %282 = vmatmul.msk.f32.gmra.mxu2 %vm211_vm9, %v158_v15 }
 0x12d   :  { %v160_v17 = vpop.f32.mrf.mxu3 }
 0x12e   :  { %v161_v18 = vadd.f32 %v325_v8, %v160_v17 }
 0x130   :  { %283 = vmatmul.msk.f32.gmra.mxu2 %vm212_vm12, %v161_v18 }
 0x18f   :  { %v250_v19 = vpop.f32.mrf.mxu0 }
 0x190   :  { %v262_v20 = vadd.f32 %v250_v19, %v110_v41 }
 0x192   :  { %266 = vst [vmem:[%s509_s7] sm:$0xff] %v262_v20 }
 0x1a3   :  { %v253_v21 = vpop.f32.mrf.mxu2 }
 0x1a4   :  { %v263_v22 = vadd.f32 %v253_v21, %v111_v49 }
 0x1a6   :  { %267 = vst [vmem:[%s509_s7 + $0x8] sm:$0xff] %v263_v22 }
 0x1ab   :  { %v256_v23 = vpop.f32.mrf.mxu2 }
 0x1ac   :  { %v264_v24 = vadd.f32 %v256_v23, %v112_v56 }
 0x1ae   :  { %268 = vst [vmem:[%s509_s7 + $0x10] sm:$0xff] %v264_v24 }
 0x1b3   :  { %v259_v25 = vpop.f32.mrf.mxu2 }
 0x1b4   :  { %v265_v26 = vadd.f32 %v259_v25, %v113_v61 }
 0x1b6   :  { %269 = vst [vmem:[%s509_s7 + $0x18] sm:$0xff] %v265_v26 }
 0x1b7   :  { %274 = vsyncpa [#allocation3], 1 }
 0x1b8   :  { %275 = vsyncpa [#allocation5], 1 }

</bundles_post_ra>
